<compile_context>
chip_gen: v6e
topology: v6e:2x2x1
jax: 0.10.0
libtpu: 0.0.40
codegen_flags: <defaults>
</compile_context>

<pallas_src>
import jax
import jax.numpy as jnp
from jax.experimental import pallas as pl
from jax.experimental.pallas import tpu as pltpu


def _round_up(x, m):
    return ((x + m - 1) // m) * m


def _vmem_capacity_bytes():
    """Per-TensorCore VMEM capacity, with a conservative v7x fallback."""
    try:
        info = pltpu.get_tpu_info()
        for attr in ("vmem_capacity_bytes", "vmem_bytes", "vmem_size_bytes"):
            v = getattr(info, attr, None)
            if v:
                return int(v)
    except Exception:
        pass
    return 64 * 1024 * 1024  # v7x per-core size; safe lower bound everywhere


def _mlp_kernel(x_ref, w1_ref, b1_ref, w2t_ref, b2_ref, o_ref):
    # In-kernel bf16 cast of the streamed activations (and the tiny resident
    # W1): x stays in the caller's dtype in HBM, the cast is cheap VPU work
    # hidden under the x DMA.  No-op when the producer already supplies bf16.
    x = x_ref[...]
    w1 = w1_ref[...]
    if x.dtype != jnp.bfloat16:
        x = x.astype(jnp.bfloat16)
    if w1.dtype != jnp.bfloat16:
        w1 = w1.astype(jnp.bfloat16)

    # Hidden layer on the MXU: (TILE_B, 29) @ (29, 32), f32 accumulation.
    h = jnp.dot(x, w1, preferred_element_type=jnp.float32)
    h = jnp.maximum(h + b1_ref[...], 0.0)               # bias + ReLU (f32)

    # Output layer, lane-dense: contract the hidden dim of both operands so the
    # stored block is (1, TILE_B) with batch on the lane axis (unmasked vst).
    # Output is a tiny fraction of HBM traffic; the VMEM budget below reserves
    # room for a possible h^T temp from this contraction.
    z = jnp.einsum("oh,bh->ob", w2t_ref[...], h,
                   preferred_element_type=jnp.float32)  # (1, TILE_B)
    z = z + b2_ref[0]                                   # scalar bias (SMEM)
    o_ref[...] = jax.nn.sigmoid(z).astype(o_ref.dtype)


def fraud_detection_forward(x, w1, b1, w2, b2, *, tile_b=32768):
    """x: (B, 29) -> (B, 1) float32 probabilities."""
    batch, feat = x.shape
    hidden = w1.shape[1]
    itemsize = jnp.dtype(x.dtype).itemsize

    # --- Per-generation VMEM budgeting -------------------------------------
    cap = _vmem_capacity_bytes()
    vmem_limit = min(64 * 1024 * 1024, (cap * 3) // 4)  # 48 MiB v7x, 64 MiB v5e/v6e
    # Worst-case VMEM bytes per batch row (29 lanes pad to 128 in VMEM):
    bytes_per_row = (2 * 128 * itemsize    # double-buffered x block
                     + 128 * 2             # in-kernel bf16 copy of the x tile
                     + 128 * 4             # f32 hidden activations (lane-padded)
                     + 32 * 4              # lane-dense h^T / einsum temp
                     + 2 * 8 * 4)          # double-buffered (1, tile_b) output
    max_rows = max(256,
                   ((vmem_limit - (6 << 20)) // bytes_per_row) // 256 * 256)

    # --- Tile / grid selection ---------------------------------------------
    tile_b = max(256, min(int(tile_b), max_rows))
    tile_b = _round_up(tile_b, 256)
    # Keep >= 2 grid steps when the batch allows it (both v7x TensorCores).
    tile_b = min(tile_b, _round_up(pl.cdiv(batch, 2), 256))
    grid = pl.cdiv(batch, tile_b)   # partial tail block; no jnp.pad pass over x

    b1_row = b1.reshape(1, hidden).astype(jnp.float32)
    w2t = w2.reshape(1, hidden).astype(jnp.float32)     # (32, 1) -> (1, 32) row
    b2_s = b2.reshape(1).astype(jnp.float32)            # scalar -> SMEM

    cost = pl.CostEstimate(
        flops=2 * batch * (feat * hidden + hidden),
        transcendentals=batch,                           # one exp per sigmoid
        bytes_accessed=(batch * feat * itemsize          # stream x (caller dtype)
                        + feat * hidden * 4              # W1 (resident)
                        + (2 * hidden + 1) * 4           # b1, W2, b2
                        + batch * 4),                    # output
    )

    out = pl.pallas_call(
        _mlp_kernel,
        out_shape=jax.ShapeDtypeStruct((1, batch), jnp.float32),
        grid=(grid,),
        in_specs=[
            pl.BlockSpec((tile_b, feat), lambda i: (i, 0)),     # x: pipelined
            pl.BlockSpec((feat, hidden), lambda i: (0, 0)),     # W1: resident
            pl.BlockSpec((1, hidden), lambda i: (0, 0)),        # b1: resident
            pl.BlockSpec((1, hidden), lambda i: (0, 0)),        # W2^T: resident
            pl.BlockSpec(memory_space=pltpu.MemorySpace.SMEM),  # b2 scalar
        ],
        out_specs=pl.BlockSpec((1, tile_b), lambda i: (0, i)),  # lane-dense
        compiler_params=pltpu.CompilerParams(
            dimension_semantics=("parallel",),   # megacore sharding on v7x
            vmem_limit_bytes=vmem_limit,
        ),
        cost_estimate=cost,
    )(x, w1, b1_row, w2t, b2_s)

    return out.reshape(batch, 1)


def init_params(key):
    """Deterministic init matching the PyTorch module's parameter shapes."""
    k1, k2, k3, k4 = jax.random.split(key, 4)
    w1 = jax.random.uniform(k1, (29, 32), jnp.float32, -0.1, 0.1)   # Linear(29, 32)
    b1 = jax.random.uniform(k2, (32,), jnp.float32, -0.1, 0.1)
    w2 = jax.random.uniform(k3, (32, 1), jnp.float32, -0.1, 0.1)    # Linear(32, 1)
    b2 = jax.random.uniform(k4, (1,), jnp.float32, -0.1, 0.1)
    return w1, b1, w2, b2


if __name__ == "__main__":
    key = jax.random.PRNGKey(0)
    k_x, k_x2, k_p = jax.random.split(key, 3)

    w1, b1, w2, b2 = init_params(k_p)

    def reference(x):
        # Same bf16 rounding of x / W1 as the kernel; f32 everywhere else.
        xc = x.astype(jnp.bfloat16).astype(jnp.float32)
        w1c = w1.astype(jnp.bfloat16).astype(jnp.float32)
        h = jnp.maximum(xc @ w1c + b1, 0.0)
        return jax.nn.sigmoid(h @ w2 + b2)

    # Small batch: single (partial) tile, no padding pass.
    x_small = jax.random.normal(k_x, (8, 29), jnp.float32)
    out_small = jax.block_until_ready(
        fraud_detection_forward(x_small, w1, b1, w2, b2))
    assert out_small.shape == (8, 1)
    assert jnp.allclose(out_small, reference(x_small), atol=1e-2, rtol=1e-2)

    # Mid-size batch, default tile: exercises the grid>=2 clamp + partial tail.
    x_big = jax.random.normal(k_x2, (600, 29), jnp.float32)
    out_big = jax.block_until_ready(
        fraud_detection_forward(x_big, w1, b1, w2, b2))
    assert out_big.shape == (600, 1)
    assert jnp.allclose(out_big, reference(x_big), atol=1e-2, rtol=1e-2)

    # Same batch with a small explicit tile: 3 grid steps, partial tail block.
    out_big2 = jax.block_until_ready(
        fraud_detection_forward(x_big, w1, b1, w2, b2, tile_b=256))
    assert out_big2.shape == (600, 1)
    assert jnp.allclose(out_big2, reference(x_big), atol=1e-2, rtol=1e-2)

    print("KERNEL_OK")
</pallas_src>

<mosaic_0001>
module attributes {stable_mosaic.version = 11 : i64} {
  func.func @_mlp_kernel(%arg0: i32, %arg1: memref<256x29xf32, #tpu.memory_space<vmem>>, %arg2: memref<29x32xf32, #tpu.memory_space<vmem>>, %arg3: memref<1x32xf32, #tpu.memory_space<vmem>>, %arg4: memref<1x32xf32, #tpu.memory_space<vmem>>, %arg5: memref<1xf32, #tpu.memory_space<smem>>, %arg6: memref<1x256xf32, #tpu.memory_space<vmem>>) attributes {dimension_semantics = [#tpu.dimension_semantics<parallel>], iteration_bounds = array<i64: 1>, scalar_prefetch = 0 : i64, scratch_operands = 0 : i64, tpu.core_type = #tpu.core_type<tc>, window_params = [{transform_indices = @transform_0, window_bounds = array<i64: 256, 29>}, {pipeline_mode = #tpu.pipeline_mode<synchronous>, transform_indices = @transform_1, window_bounds = array<i64: 29, 32>}, {pipeline_mode = #tpu.pipeline_mode<synchronous>, transform_indices = @transform_2, window_bounds = array<i64: 1, 32>}, {pipeline_mode = #tpu.pipeline_mode<synchronous>, transform_indices = @transform_3, window_bounds = array<i64: 1, 32>}, {transform_indices = @transform_4, window_bounds = array<i64: 1>}, {transform_indices = @transform_5, window_bounds = array<i64: 1, 256>}]} {
    %c0 = arith.constant 0 : index
    %c0_0 = arith.constant 0 : index
    %0 = vector.load %arg1[%c0, %c0_0] : memref<256x29xf32, #tpu.memory_space<vmem>>, vector<256x29xf32>
    %c0_1 = arith.constant 0 : index
    %c0_2 = arith.constant 0 : index
    %1 = vector.load %arg2[%c0_1, %c0_2] : memref<29x32xf32, #tpu.memory_space<vmem>>, vector<29x32xf32>
    %2 = arith.truncf %0 : vector<256x29xf32> to vector<256x29xbf16>
    %3 = arith.truncf %1 : vector<29x32xf32> to vector<29x32xbf16>
    %cst = arith.constant dense<0.000000e+00> : vector<256x32xf32>
    %4 = tpu.matmul %2, %3, %cst {dimension_numbers = #tpu.dot_dimension_numbers<[1], [0], [0], [1], [0, 0, 1, 1], [], []>} : vector<256x29xbf16>, vector<29x32xbf16>, vector<256x32xf32> -> vector<256x32xf32>
    %c0_3 = arith.constant 0 : index
    %c0_4 = arith.constant 0 : index
    %5 = vector.load %arg3[%c0_3, %c0_4] : memref<1x32xf32, #tpu.memory_space<vmem>>, vector<1x32xf32>
    %6 = vector.broadcast %5 : vector<1x32xf32> to vector<256x32xf32>
    %7 = arith.addf %4, %6 : vector<256x32xf32>
    %cst_5 = arith.constant 0.000000e+00 : f32
    %8 = vector.broadcast %cst_5 : f32 to vector<256x32xf32>
    %9 = arith.maximumf %7, %8 : vector<256x32xf32>
    %c0_6 = arith.constant 0 : index
    %c0_7 = arith.constant 0 : index
    %10 = vector.load %arg4[%c0_6, %c0_7] : memref<1x32xf32, #tpu.memory_space<vmem>>, vector<1x32xf32>
    "tpu.trace_start"() <{level = 10 : i32, message = "oh,bh->ob"}> : () -> ()
    %cst_8 = arith.constant dense<0.000000e+00> : vector<1x256xf32>
    %11 = tpu.matmul %10, %9, %cst_8 {dimension_numbers = #tpu.dot_dimension_numbers<[1], [1], [0], [0], [0, 0, 1, 0], [], []>} : vector<1x32xf32>, vector<256x32xf32>, vector<1x256xf32> -> vector<1x256xf32>
    "tpu.trace_stop"() : () -> ()
    %c0_9 = arith.constant 0 : index
    %12 = memref.load %arg5[%c0_9] : memref<1xf32, #tpu.memory_space<smem>>
    %13 = vector.broadcast %12 : f32 to vector<1x256xf32>
    %14 = arith.addf %11, %13 : vector<1x256xf32>
    %15 = arith.negf %14 : vector<1x256xf32>
    %16 = math.exp %15 : vector<1x256xf32>
    %cst_10 = arith.constant 1.000000e+00 : f32
    %17 = vector.broadcast %cst_10 : f32 to vector<1x256xf32>
    %18 = arith.addf %17, %16 : vector<1x256xf32>
    %19 = arith.divf %17, %18 : vector<1x256xf32>
    %c0_11 = arith.constant 0 : index
    %c0_12 = arith.constant 0 : index
    %20 = vector.load %arg6[%c0_11, %c0_12] : memref<1x256xf32, #tpu.memory_space<vmem>>, vector<1x256xf32>
    tpu.vector_store %arg6[%c0_11, %c0_12], %19 {strides = array<i32>} : memref<1x256xf32, #tpu.memory_space<vmem>>, vector<1x256xf32>,
    return
  }
  func.func @transform_0(%arg0: i32) -> (i32, i32) {
    %c0_i32 = arith.constant 0 : i32
    %c0_i32_0 = arith.constant 0 : i32
    return %arg0, %c0_i32 : i32, i32
  }
  func.func @transform_1(%arg0: i32) -> (i32, i32) {
    %c0_i32 = arith.constant 0 : i32
    %c0_i32_0 = arith.constant 0 : i32
    %c0_i32_1 = arith.constant 0 : i32
    return %c0_i32, %c0_i32_0 : i32, i32
  }
  func.func @transform_2(%arg0: i32) -> (i32, i32) {
    %c0_i32 = arith.constant 0 : i32
    %c0_i32_0 = arith.constant 0 : i32
    %c0_i32_1 = arith.constant 0 : i32
    return %c0_i32, %c0_i32_0 : i32, i32
  }
  func.func @transform_3(%arg0: i32) -> (i32, i32) {
    %c0_i32 = arith.constant 0 : i32
    %c0_i32_0 = arith.constant 0 : i32
    %c0_i32_1 = arith.constant 0 : i32
    return %c0_i32, %c0_i32_0 : i32, i32
  }
  func.func @transform_4(%arg0: i32) -> i32 {
    %c0_i32 = arith.constant 0 : i32
    %c0_i32_0 = arith.constant 0 : i32
    return %c0_i32 : i32
  }
  func.func @transform_5(%arg0: i32) -> (i32, i32) {
    %c0_i32 = arith.constant 0 : i32
    %c0_i32_0 = arith.constant 0 : i32
    return %c0_i32, %arg0 : i32, i32
  }
}

</mosaic_0001>

<bundles_post_ra>
// kernel: tpu_custom_call.1
= control target key start
LH: loop header
LB: loop body
LE: loop exit
PB: predicated region body
PF: predicated region fallthrough
CT: control target
= control target key end

     0   :  { %11 = vsyncpa [#allocation4], 0  ;;  %s995_s0 = inlined_call_operand.hbm [shape: f32[8,29], index: 0, kind: input, shape index: {}]   ;;  %s996_s1 = inlined_call_operand.hbm [shape: f32[29,32], index: 1, kind: input, shape index: {}]   ;;  %s997_s2 = inlined_call_operand.vmem [shape: f32[1,32], index: 2, kind: input, shape index: {}]   ;;  %s998_s3 = inlined_call_operand.vmem [shape: f32[1,32], index: 3, kind: input, shape index: {}]   ;;  %s999_s4 = inlined_call_operand.<no memory space> [shape: f32[1], index: 4, kind: input, shape index: {}]   ;;  %s1000_s5 = inlined_call_operand.hbm [shape: f32[1,8], index: 5, kind: output, shape index: {}]  }
   0x1   :  { %12 = vsyncpa [#allocation7], 0 }
   0x2   :  { %13 = vsyncpa [#allocation5], 0 }
   0x3   :  { %18 = vsyncadd [#allocation4], 3968  ;;  %s807_s18 = smov [#allocation3]  }
   0x4   :  { %s19_s19 = sshll.u32 %s807_s18, 4  ;;  %s20_s19 = int_to_ptr.vmem [resolvable:$true] %s19_s19 }
   0x5   :  { %s749_s20 = scalar_lea.vmem %s20_s19, 128  ;;  %s753_s21 = scalar_lea.vmem %s20_s19, 4096 }
   0x6   :  { %p750_p0 = scmp.ne.s32.totalorder %s20_s19, %s749_s20  ;;  %p754_p1 = scmp.lt.s32.totalorder %s20_s19, %s20_s19 }
   0x7   :  { %p755_p2 = scmp.lt.s32.totalorder %s753_s21, %s749_s20 }
   0x9   :  { %p756_p3 = por %p755_p2, %p754_p1 }
   0xb   :  { %p757_p4 = pnand %p756_p3, %p750_p0 }
   0xd   :  { %760 = shalt.err (!%p757_p4)
}
   0xe   :  { %s808_s22 = smov 128   ;;  %s809_s23 = smov 8  }
   0xf   :  { %25 = dma.hbm_to_vmem [thread:$0]  %s995_s0, 128, %s20_s19, [#allocation4], %s808_s22, %s808_s22, %s809_s23  }
  0x10   :  { %s810_s26 = smov [#allocation6]  }
  0x11   :  { %s31_s27 = sshll.u32 %s810_s26, 4  ;;  %s32_s27 = int_to_ptr.vmem [resolvable:$true] %s31_s27 }
  0x12   :  { %s769_s28 = scalar_lea.vmem %s32_s27, 512  ;;  %p774_p6 = scmp.lt.s32.totalorder %s32_s27, %s32_s27 }
  0x13   :  { %p770_p5 = scmp.ne.s32.totalorder %s32_s27, %s769_s28  ;;  %p775_p7 = scmp.lt.s32.totalorder %s769_s28, %s769_s28 }
  0x15   :  { %p776_p8 = por %p775_p7, %p774_p6 }
  0x17   :  { %p777_p9 = pnand %p776_p8, %p770_p5 }
  0x19   :  { %780 = shalt.err (!%p777_p9)
}
  0x1a   :  { %37 = dma.hbm_to_vmem [thread:$0]  %s996_s1, 512, %s32_s27, [#allocation7], %s808_s22, %s808_s22, %s809_s23  }
  0x1b   :  { %801 = dma.done.wait [#allocation4], 4096  }
  0x1c   :  { %802 = vsyncadd [#allocation4], 4294963200 }
  0x1d   :  { %803 = dma.done.wait [#allocation7], 512  }
  0x1e   :  { %804 = vsyncadd [#allocation7], 4294966784  ;;  %vm161_vm0 = vcmask 1045504   ;;  %vm162_vm1 = vcmask 1046528   ;;  %v811_v0 = vmov 65535   ;;  %v85_v2 = vld [vmem:[#allocation6 + $0x10] sm:$0xff] }
  0x1f   :  { %v163_v1 = vsel %vm161_vm0, 4294967295, %v811_v0  ;;  %v86_v3 = vld [vmem:[#allocation6 + $0x18] sm:$0x1f]  ;;  %v83_v5 = vld [vmem:[#allocation6] sm:$0xff]  ;;  %v84_v7 = vld [vmem:[#allocation6 + $0x8] sm:$0xff]  ;;  %vm112_vm2 = vcmask 236544  }
  0x20   :  { %v164_v4 = vsel %vm162_vm1, %v163_v1, 0  ;;  %v104_v6 = vpack.c.bf16 %v86_v3, %v85_v2  ;;  %v51_v8 = vld [vmem:[#allocation3] sm:$0xff]  ;;  %v52_v9 = vld [vmem:[#allocation3 + $0x8] sm:$0xff]  ;;  %v103_v12 = vpack.c.bf16 %v84_v7, %v83_v5  ;;  %v53_v13 = vld [vmem:[#allocation3 + $0x10] sm:$0xff]  ;;  %vm364_vm3 = vcmask 261120  }
  0x21   :  { %v87_v10 = vpack.c.bf16 %v52_v9, %v51_v8  ;;  %v54_v14 = vld [vmem:[#allocation3 + $0x18] sm:$0xff]  ;;  %v55_v15 = vld [vmem:[#allocation3 + $0x20] sm:$0xff]  ;;  %v56_v16 = vld [vmem:[#allocation3 + $0x28] sm:$0xff] }
  0x22   :  { %v166_v11 = vand.u32 %v164_v4, %v104_v6  ;;  %v88_v17 = vpack.c.bf16 %v54_v14, %v53_v13  ;;  %v89_v18 = vpack.c.bf16 %v56_v16, %v55_v15  ;;  %v57_v19 = vld [vmem:[#allocation3 + $0x30] sm:$0xff]  ;;  %v58_v20 = vld [vmem:[#allocation3 + $0x38] sm:$0xff]  ;;  %v59_v21 = vld [vmem:[#allocation3 + $0x40] sm:$0xff] }
  0x23   :  { %694 = vmatprep.mubr.msk.bf16.mxu0 %vm112_vm2, %v87_v10  ;;  %v60_v22 = vld [vmem:[#allocation3 + $0x48] sm:$0xff]  ;;  %v90_v23 = vpack.c.bf16 %v58_v20, %v57_v19  ;;  %v61_v25 = vld [vmem:[#allocation3 + $0x50] sm:$0xff]  ;;  %v62_v26 = vld [vmem:[#allocation3 + $0x58] sm:$0xff] }
  0x24   :  { %690 = vmatprep.subr.bf16.mxu0 %v166_v11  ;;  %v91_v24 = vpack.c.bf16 %v60_v22, %v59_v21  ;;  %v63_v27 = vld [vmem:[#allocation3 + $0x60] sm:$0xff]  ;;  %v64_v28 = vld [vmem:[#allocation3 + $0x68] sm:$0xff]  ;;  %v92_v29 = vpack.c.bf16 %v62_v26, %v61_v25  ;;  %v65_v31 = vld [vmem:[#allocation3 + $0x70] sm:$0xff] }
  0x25   :  { %691 = vmatpush3.bf16.msra.mxu0 %v166_v11  ;;  %v93_v30 = vpack.c.bf16 %v64_v28, %v63_v27  ;;  %v66_v32 = vld [vmem:[#allocation3 + $0x78] sm:$0xff]  ;;  %v67_v33 = vld [vmem:[#allocation3 + $0x80] sm:$0xff]  ;;  %v68_v34 = vld [vmem:[#allocation3 + $0x88] sm:$0xff] }
  0x26   :  { %692 = vmatprep.subr.bf16.mxu0 %v103_v12  ;;  %v94_v35 = vpack.c.bf16 %v66_v32, %v65_v31  ;;  %v95_v36 = vpack.c.bf16 %v68_v34, %v67_v33  ;;  %v69_v37 = vld [vmem:[#allocation3 + $0x90] sm:$0xff]  ;;  %v70_v38 = vld [vmem:[#allocation3 + $0x98] sm:$0xff]  ;;  %v71_v39 = vld [vmem:[#allocation3 + $0xa0] sm:$0xff] }
  0x27   :  { %v72_v40 = vld [vmem:[#allocation3 + $0xa8] sm:$0xff]  ;;  %v96_v41 = vpack.c.bf16 %v70_v38, %v69_v37  ;;  %v73_v43 = vld [vmem:[#allocation3 + $0xb0] sm:$0xff]  ;;  %v74_v44 = vld [vmem:[#allocation3 + $0xb8] sm:$0xff] }
  0x28   :  { %v97_v42 = vpack.c.bf16 %v72_v40, %v71_v39  ;;  %v75_v45 = vld [vmem:[#allocation3 + $0xc0] sm:$0xff]  ;;  %v76_v46 = vld [vmem:[#allocation3 + $0xc8] sm:$0xff]  ;;  %v98_v47 = vpack.c.bf16 %v74_v44, %v73_v43  ;;  %v77_v49 = vld [vmem:[#allocation3 + $0xd0] sm:$0xff] }
  0x29   :  { %693 = vmatpush3.bf16.msra.mxu0 %v103_v12  ;;  %v99_v48 = vpack.c.bf16 %v76_v46, %v75_v45  ;;  %v78_v50 = vld [vmem:[#allocation3 + $0xd8] sm:$0xff]  ;;  %v79_v51 = vld [vmem:[#allocation3 + $0xe0] sm:$0xff]  ;;  %v80_v52 = vld [vmem:[#allocation3 + $0xe8] sm:$0xff] }
  0x2a   :  { %v100_v53 = vpack.c.bf16 %v78_v50, %v77_v49  ;;  %v101_v54 = vpack.c.bf16 %v80_v52, %v79_v51  ;;  %v81_v55 = vld [vmem:[#allocation3 + $0xf0] sm:$0xff]  ;;  %v82_v56 = vld [vmem:[#allocation3 + $0xf8] sm:$0xff]  ;;  %v869_v58 = vld [vmem:[%s998_s3] sm:$0x1] }
  0x2b   :  { %v102_v57 = vpack.c.bf16 %v82_v56, %v81_v55  ;;  %688 = vmatprep.mubr.msk.f32.mxu1 %vm364_vm3, %v869_v58  ;;  %v906_v25 = vld [vmem:[%s997_s2] ss:$0 sm:$0xff] }
  0x2c   :  { %695 = vmatmul.mubr.msk.bf16.vlgmr.msra.gmra.mxu0 %vm112_vm2, %v88_v17 }
  0x2d   :  { %698 = vmatprep.mubr.msk.bf16.mxu0 %vm112_vm2, %v89_v18 }
  0x34   :  { %699 = vmatmul.mubr.msk.bf16.gmra.mxu0 %vm112_vm2, %v90_v23 }
  0x35   :  { %702 = vmatprep.mubr.msk.bf16.mxu0 %vm112_vm2, %v91_v24 }
  0x3c   :  { %703 = vmatmul.mubr.msk.bf16.gmra.mxu0 %vm112_vm2, %v92_v29 }
  0x3d   :  { %706 = vmatprep.mubr.msk.bf16.mxu0 %vm112_vm2, %v93_v30 }
  0x44   :  { %707 = vmatmul.mubr.msk.bf16.gmra.mxu0 %vm112_vm2, %v94_v35 }
  0x45   :  { %710 = vmatprep.mubr.msk.bf16.mxu0 %vm112_vm2, %v95_v36 }
  0x4c   :  { %711 = vmatmul.mubr.msk.bf16.gmra.mxu0 %vm112_vm2, %v96_v41 }
  0x4d   :  { %714 = vmatprep.mubr.msk.bf16.mxu0 %vm112_vm2, %v97_v42 }
  0x54   :  { %715 = vmatmul.mubr.msk.bf16.gmra.mxu0 %vm112_vm2, %v98_v47 }
  0x55   :  { %718 = vmatprep.mubr.msk.bf16.mxu0 %vm112_vm2, %v99_v48 }
  0x5c   :  { %719 = vmatmul.mubr.msk.bf16.gmra.mxu0 %vm112_vm2, %v100_v53 }
  0x5d   :  { %722 = vmatprep.mubr.msk.bf16.mxu0 %vm112_vm2, %v101_v54 }
  0x64   :  { %723 = vmatmul.mubr.msk.bf16.gmra.mxu0 %vm112_vm2, %v102_v57 }
  0xec   :  { %v873_v59 = vpop.f32.mrf.mxu0 }
  0xee   :  { %v875_v60 = vpop.f32.mrf.mxu0 }
  0xf0   :  { %v877_v61 = vpop.f32.mrf.mxu0 }
  0xf2   :  { %v879_v62 = vpop.f32.mrf.mxu0 }
  0xf4   :  { %v881_v63 = vpop.f32.mrf.mxu0 }
  0xf6   :  { %v883_v0 = vpop.f32.mrf.mxu0 }
  0xf8   :  { %v885_v1 = vpop.f32.mrf.mxu0 }
  0xfa   :  { %v887_v2 = vpop.f32.mrf.mxu0 }
  0xfc   :  { %v704_v3 = vpop.f32.mrf.mxu0 }
  0xfd   :  { %v243_v48 = vadd.f32 %v704_v3, %v906_v25 }
  0xfe   :  { %v889_v4 = vpop.f32.mrf.mxu0 }
  0xff   :  { %v339_v52 = vmax.f32 %v243_v48, 0.0  ;;  %v235_v56 = vadd.f32 %v906_v25, %v889_v4  ;;  %v227_v4 = vadd.f32 %v881_v63, %v906_v25  ;;  %v219_v63 = vadd.f32 %v906_v25, %v883_v0 }
 0x100   :  { %v705_v5 = vpop.f32.mrf.mxu0  ;;  %v211_v0 = vadd.f32 %v873_v59, %v906_v25  ;;  %v203_v59 = vadd.f32 %v906_v25, %v875_v60 }
 0x101   :  { %v246_v44 = vadd.f32 %v705_v5, %v906_v25 }
 0x102   :  { %v237_v6 = vpop.f32.mrf.mxu0 }
 0x103   :  { %v340_v49 = vmax.f32 %v246_v44, 0.0  ;;  %v238_v53 = vadd.f32 %v906_v25, %v237_v6  ;;  %v230_v6 = vadd.f32 %v885_v1, %v906_v25  ;;  %v335_v1 = vmax.f32 %v227_v4, 0.0 }
 0x104   :  { %v708_v7 = vpop.f32.mrf.mxu0 }
 0x105   :  { %v259_v32 = vadd.f32 %v708_v7, %v906_v25  ;;  %v338_v57 = vmax.f32 %v238_v53, 0.0  ;;  %v337_v7 = vmax.f32 %v235_v56, 0.0 }
 0x106   :  { %v250_v8 = vpop.f32.mrf.mxu0 }
 0x107   :  { %v343_v36 = vmax.f32 %v259_v32, 0.0  ;;  %v251_v40 = vadd.f32 %v906_v25, %v250_v8  ;;  %v329_v32 = vmax.f32 %v203_v59, 0.0 }
 0x108   :  { %v709_v9 = vpop.f32.mrf.mxu0 }
 0x109   :  { %v262_v26 = vadd.f32 %v709_v9, %v906_v25  ;;  %v341_v45 = vmax.f32 %v251_v40, 0.0  ;;  %v812_v40 = vmov 1966171168  }
 0x10a   :  { %v253_v10 = vpop.f32.mrf.mxu0 }
 0x10b   :  { %v344_v33 = vmax.f32 %v262_v26, 0.0  ;;  %v254_v37 = vadd.f32 %v906_v25, %v253_v10  ;;  %v336_v10 = vmax.f32 %v230_v6, 0.0 }
 0x10c   :  { %v891_v11 = vpop.f32.mrf.mxu0 }
 0x10d   :  { %v342_v41 = vmax.f32 %v254_v37, 0.0 }
 0x10e   :  { %v893_v12 = vpop.f32.mrf.mxu0 }
 0x110   :  { %v895_v13 = vpop.f32.mrf.mxu0 }
 0x112   :  { %v897_v14 = vpop.f32.mrf.mxu0 }
 0x114   :  { %v716_v15 = vpop.f32.mrf.mxu0 }
 0x115   :  { %v291_v8 = vadd.f32 %v716_v15, %v906_v25  ;;  %v222_v15 = vadd.f32 %v906_v25, %v887_v2  ;;  %v214_v2 = vadd.f32 %v877_v61, %v906_v25  ;;  %v331_v61 = vmax.f32 %v211_v0, 0.0 }
 0x116   :  { %v899_v16 = vpop.f32.mrf.mxu0 }
 0x118   :  { %v717_v17 = vpop.f32.mrf.mxu0 }
 0x119   :  { %v294_v3 = vadd.f32 %v717_v17, %v906_v25  ;;  %v351_v17 = vmax.f32 %v291_v8, 0.0 }
 0x11a   :  { %v901_v18 = vpop.f32.mrf.mxu0 }
 0x11b   :  { %v352_v9 = vmax.f32 %v294_v3, 0.0 }
 0x11c   :  { %v720_v19 = vpop.f32.mrf.mxu0 }
 0x11d   :  { %v307_v46 = vadd.f32 %v720_v19, %v906_v25  ;;  %v286_v19 = vadd.f32 %v906_v25, %v901_v18  ;;  %v334_v18 = vmax.f32 %v222_v15, 0.0 }
 0x11e   :  { %v298_v20 = vpop.f32.mrf.mxu0 }
 0x11f   :  { %v355_v50 = vmax.f32 %v307_v46, 0.0  ;;  %v299_v54 = vadd.f32 %v906_v25, %v298_v20  ;;  %v283_v20 = vadd.f32 %v906_v25, %v899_v16  ;;  %v333_v16 = vmax.f32 %v219_v63, 0.0 }
 0x120   :  { %v721_v21 = vpop.f32.mrf.mxu0 }
 0x121   :  { %v310_v42 = vadd.f32 %v721_v21, %v906_v25  ;;  %v353_v5 = vmax.f32 %v299_v54, 0.0  ;;  %v350_v21 = vmax.f32 %v286_v19, 0.0 }
 0x122   :  { %v301_v22 = vpop.f32.mrf.mxu0 }
 0x123   :  { %v356_v47 = vmax.f32 %v310_v42, 0.0  ;;  %v302_v51 = vadd.f32 %v906_v25, %v301_v22  ;;  %v278_v22 = vadd.f32 %v895_v13, %v906_v25  ;;  %v332_v13 = vmax.f32 %v214_v2, 0.0 }
 0x124   :  { %v724_v23 = vpop.f32.mrf.mxu0 }
 0x125   :  { %v323_v28 = vadd.f32 %v724_v23, %v906_v25  ;;  %v354_v55 = vmax.f32 %v302_v51, 0.0  ;;  %v349_v23 = vmax.f32 %v283_v20, 0.0  ;;  %v348_v26 = vmax.f32 %v278_v22, 0.0 }
 0x126   :  { %v314_v24 = vpop.f32.mrf.mxu0 }
 0x127   :  { %v359_v34 = vmax.f32 %v323_v28, 0.0  ;;  %v315_v38 = vadd.f32 %v906_v25, %v314_v24  ;;  %v275_v24 = vadd.f32 %v891_v11, %v906_v25  ;;  %v270_v28 = vadd.f32 %v906_v25, %v897_v14 }
 0x128   :  { %v725_v27 = vpop.f32.mrf.mxu0  ;;  %v206_v11 = vadd.f32 %v906_v25, %v879_v62  ;;  %v363_v62 = vstv %s999_s4 }
 0x129   :  { %v326_v29 = vadd.f32 %v725_v27, %v906_v25  ;;  %v357_v43 = vmax.f32 %v315_v38, 0.0  ;;  %v347_v27 = vmax.f32 %v275_v24, 0.0 }
 0x12a   :  { %v317_v30 = vpop.f32.mrf.mxu0  ;;  %v330_v14 = vmax.f32 %v206_v11, 0.0 }
 0x12b   :  { %v360_v31 = vmax.f32 %v326_v29, 0.0  ;;  %v318_v35 = vadd.f32 %v906_v25, %v317_v30  ;;  %v267_v29 = vadd.f32 %v906_v25, %v893_v12  ;;  %v346_v30 = vmax.f32 %v270_v28, 0.0 }
 0x12d   :  { %656 = vmatprep.subr.msk.mxu1 %vm364_vm3, %v360_v31  ;;  %v358_v39 = vmax.f32 %v318_v35, 0.0  ;;  %v345_v31 = vmax.f32 %v267_v29, 0.0 }
 0x12e   :  { %657 = vmatpush3.xpose.msk.msra.mxu1 %vm364_vm3, %v344_v33 }
 0x12f   :  { %658 = vmatprep.subr.msk.mxu1 %vm364_vm3, %v359_v34 }
 0x132   :  { %659 = vmatpush3.xpose.msk.msra.mxu1 %vm364_vm3, %v343_v36 }
 0x133   :  { %660 = vmatprep.subr.msk.mxu1 %vm364_vm3, %v358_v39 }
 0x136   :  { %661 = vmatpush3.xpose.msk.msra.mxu1 %vm364_vm3, %v342_v41  ;;  %v553_v41 = vlaneseq }
 0x137   :  { %662 = vmatprep.subr.msk.mxu1 %vm364_vm3, %v357_v43 }
 0x138   :  { %v554_v43 = vshrl.u32 %v553_v41, 7  ;;  %vm567_vm4 = vcmp.lt.s32.totalorder %v553_v41, 256 }
 0x13a   :  { %663 = vmatpush3.xpose.msk.msra.mxu1 %vm364_vm3, %v341_v45 }
 0x13b   :  { %664 = vmatprep.subr.msk.mxu1 %vm364_vm3, %v356_v47 }
 0x13e   :  { %665 = vmatpush3.xpose.msk.msra.mxu1 %vm364_vm3, %v340_v49 }
 0x13f   :  { %666 = vmatprep.subr.msk.mxu1 %vm364_vm3, %v355_v50 }
 0x142   :  { %667 = vmatpush3.xpose.msk.msra.mxu1 %vm364_vm3, %v339_v52 }
 0x143   :  { %668 = vmatprep.subr.msk.mxu1 %vm364_vm3, %v354_v55 }
 0x146   :  { %669 = vmatpush3.xpose.msk.msra.mxu1 %vm364_vm3, %v338_v57 }
 0x147   :  { %670 = vmatprep.subr.msk.mxu1 %vm364_vm3, %v353_v5 }
 0x14a   :  { %671 = vmatpush3.xpose.msk.msra.mxu1 %vm364_vm3, %v337_v7 }
 0x14b   :  { %672 = vmatprep.subr.msk.mxu1 %vm364_vm3, %v352_v9 }
 0x14e   :  { %673 = vmatpush3.xpose.msk.msra.mxu1 %vm364_vm3, %v336_v10 }
 0x14f   :  { %674 = vmatprep.subr.msk.mxu1 %vm364_vm3, %v351_v17 }
 0x152   :  { %675 = vmatpush3.xpose.msk.msra.mxu1 %vm364_vm3, %v335_v1 }
 0x153   :  { %676 = vmatprep.subr.msk.mxu1 %vm364_vm3, %v350_v21 }
 0x156   :  { %677 = vmatpush3.xpose.msk.msra.mxu1 %vm364_vm3, %v334_v18 }
 0x157   :  { %678 = vmatprep.subr.msk.mxu1 %vm364_vm3, %v349_v23 }
 0x15a   :  { %679 = vmatpush3.xpose.msk.msra.mxu1 %vm364_vm3, %v333_v16 }
 0x15b   :  { %680 = vmatprep.subr.msk.mxu1 %vm364_vm3, %v348_v26 }
 0x15e   :  { %681 = vmatpush3.xpose.msk.msra.mxu1 %vm364_vm3, %v332_v13 }
 0x15f   :  { %682 = vmatprep.subr.msk.mxu1 %vm364_vm3, %v347_v27 }
 0x162   :  { %683 = vmatpush3.xpose.msk.msra.mxu1 %vm364_vm3, %v331_v61 }
 0x163   :  { %684 = vmatprep.subr.msk.mxu1 %vm364_vm3, %v346_v30 }
 0x166   :  { %685 = vmatpush3.xpose.msk.msra.mxu1 %vm364_vm3, %v330_v14 }
 0x167   :  { %686 = vmatprep.subr.msk.mxu1 %vm364_vm3, %v345_v31 }
 0x16a   :  { %687 = vmatpush3.xpose.msk.msra.mxu1 %vm364_vm3, %v329_v32 }
 0x16d   :  { %689 = vmatmul.mubr.msk.f32.vlgmr.msra.gmra.mxu1 %vm364_vm3, %v869_v58  ;;  %v551_v58 = vunpack.c.l.s4 %v812_v40 }
 0x16f   :  { %v552_v42 = vunpack.c.0.s8 %v551_v58 }
 0x171   :  { %v555_v45 = vsub.s32 %v552_v42, %v554_v43 }
 0x22d   :  { %v530_v12 = vpop.f32.mrf.mxu1 }
 0x22e   :  { %v531_v33 = vadd.f32 %v530_v12, %v363_v62 }
 0x22f   :  { %v532_v34 = vpop.f32.mrf.mxu1 }
 0x230   :  { %v636_v60 = vmul.f32 -1.442695, %v531_v33  ;;  %v533_v25 = vadd.f32 %v532_v34, %v363_v62 }
 0x232   :  { %733 = vpow2.f32 %v636_v60  ;;  %v637_v35 = vmul.f32 -1.442695, %v533_v25 }
 0x234   :  { %735 = vpow2.f32 %v637_v35 }
 0x23f   :  { %v734_v36 = vpop.eup %733 }
 0x240   :  { %v541_v37 = vadd.f32 1.0, %v734_v36 }
 0x241   :  { %v736_v38 = vpop.eup %735 }
 0x242   :  { %v542_v39 = vadd.f32 1.0, %v736_v38  ;;  %737 = vrcp.f32 %v541_v37 }
 0x244   :  { %739 = vrcp.f32 %v542_v39 }
 0x24f   :  { %v738_v44 = vpop.eup %737 }
 0x251   :  { %v740_v46 = vpop.eup %739 }
 0x252   :  { %v549_v47 = vcombine.low %v738_v44, %v740_v46 }
 0x254   :  { %v556_v48 = vrot.slane %v549_v47, %v555_v45 }
 0x256   :  { %v563_v49 = vrot.slane %v556_v48, %v555_v45 }
 0x258   :  { %569 = vst.msk [vmem:[#allocation8] sm:$0x3] %vm567_vm4, %v563_v49 }
 0x259   :  { %574 = vsyncadd [#allocation5], 16  ;;  %s813_s4 = smov [#allocation8]  }
 0x25a   :  { %s576_s8 = sshll.u32 %s813_s4, 4  ;;  %s577_s8 = int_to_ptr.vmem [resolvable:$true] %s576_s8 }
 0x25b   :  { %s781_s9 = scalar_lea.vmem %s577_s8, 16  ;;  %s785_s10 = scalar_lea.vmem %s577_s8, 32 }
 0x25c   :  { %p782_p10 = scmp.ne.s32.totalorder %s577_s8, %s781_s9  ;;  %p786_p11 = scmp.lt.s32.totalorder %s577_s8, %s577_s8 }
 0x25d   :  { %p787_p12 = scmp.lt.s32.totalorder %s785_s10, %s781_s9 }
 0x25f   :  { %p788_p13 = por %p787_p12, %p786_p11 }
 0x261   :  { %p789_p0 = pnand %p788_p13, %p782_p10 }
 0x263   :  { %792 = shalt.err (!%p789_p0)
}
 0x264   :  { %579 = dma.vmem_to_hbm [thread:$0]  %s577_s8, 16, %s1000_s5, [#allocation5]  }
 0x265   :  { %805 = dma.done.wait [#allocation5], 32  }
 0x266   :  { %806 = vsyncadd [#allocation5], 4294967264 }
 0x267   :  { %583 = vsyncpa [#allocation4], 1 }
 0x268   :  { %584 = vsyncpa [#allocation7], 1 }
 0x269   :  { %585 = vsyncpa [#allocation5], 1 }

</bundles_post_ra>
